<compile_context>
chip_gen: v6e
topology: v6e:2x2x1
jax: 0.10.0
libtpu: 0.0.40
codegen_flags: <defaults>
</compile_context>

<pallas_src>
import jax
import jax.numpy as jnp
from jax import lax
from jax.experimental import pallas as pl
from jax.experimental.pallas import tpu as pltpu

# ---------------- model constants (PyTorch module defaults) ----------------
D_INIT = 23 + 23          # 46
D_MSA = 256
D_PAIR = 128
MINPOS, MAXPOS = -31, 31
NBIN = abs(MINPOS) + MAXPOS + 1      # 63
NB = NBIN + 1                        # positional table rows (64)
NAA = 23                             # amino-acid vocab

_MIB = 1024 * 1024
_TARGET_OUT_TILE = 8 * _MIB          # ~85% of HBM roofline; bigger buys little


# ---------------------------- VMEM budgeting ----------------------------
def _vmem_capacity_bytes():
    try:
        info = pltpu.get_tpu_info()
        cap = getattr(info, "vmem_capacity_bytes", None)
        if cap:
            return int(cap)
    except Exception:
        pass
    return 64 * _MIB   # v7x floor -> conservative everywhere


def _vmem_budget():
    cap = _vmem_capacity_bytes()
    return min(cap // 2, 48 * _MIB), cap


def _divisors_desc(n):
    return sorted([d for d in range(1, n + 1) if n % d == 0], reverse=True)


def _prefer_even_steps(divs, best, steps_of):
    """v7x has 2 TensorCores: prefer an even (>=2) number of parallel grid steps
    so neither core idles.  Never shrink the tile by more than 2x for this."""
    s = steps_of(best)
    if s >= 2 and s % 2 == 0:
        return best
    for d in divs:
        if d <= best and 2 * d >= best and steps_of(d) >= 2 and steps_of(d) % 2 == 0:
            return d
    return best


def _msa_ws(tn, L, out_bytes):
    inp = tn * L * 128 * 4          # d_init=46 lane-pads to 128 in VMEM
    q = L * D_MSA * 4
    w = 48 * D_MSA * 4              # 46 sublane-pads to 48
    out = tn * L * D_MSA * out_bytes
    inter = 2 * tn * L * D_MSA * 4  # f32 matmul result + sum before cast
    return 2 * (inp + q + w + out) + inter


def _pick_msa_tile(B, N, L, out_bytes):
    budget, cap = _vmem_budget()
    divs = _divisors_desc(N)
    best = 1
    for tn in divs:
        if (tn * L * D_MSA * out_bytes <= _TARGET_OUT_TILE
                and _msa_ws(tn, L, out_bytes) <= budget):
            best = tn
            break
    # TODO(synk): pad N in the wrapper (and slice the output) when N is prime /
    # awkward so the tile does not degenerate to 1 row per grid step.
    best = _prefer_even_steps(divs, best, lambda d: B * (N // d))
    limit = int(min(cap - 8 * _MIB,
                    max(32 * _MIB, _msa_ws(best, L, out_bytes) + 8 * _MIB)))
    return best, limit


def _pair_ws(ti, L, out_bytes):
    sc = ti * L * 4
    idx_i = ti * 128 * 4            # (ti, 1) lane-padded (tiny)
    idx_j = 8 * L * 4               # (1, L) sublane-padded
    left = L * D_PAIR * 4
    right = ti * D_PAIR * 4
    tab = NB * D_PAIR * 4
    out = ti * L * D_PAIR * out_bytes
    inter = ti * L * NB * 4 + 2 * ti * L * D_PAIR * 4   # one-hot + f32 temporaries
    return 2 * (sc + idx_i + idx_j + left + right + tab + out) + inter


def _pick_pair_tile(B, L, out_bytes):
    budget, cap = _vmem_budget()
    divs = _divisors_desc(L)
    # sublane constraint: (1, ti, L)/(1, ti, dp) blocks need ti % 8 == 0 unless ti == L
    cands = [d for d in divs if d % 8 == 0 or d == L]
    best = None
    for ti in cands:
        if (ti * L * D_PAIR * out_bytes <= _TARGET_OUT_TILE
                and _pair_ws(ti, L, out_bytes) <= budget):
            best = ti
            break
    if best is None:
        best = min(cands)   # smallest legal tile; may exceed soft target for awkward L
    best = _prefer_even_steps(cands, best, lambda d: B * (L // d))
    limit = int(min(cap - 8 * _MIB,
                    max(32 * _MIB, _pair_ws(best, L, out_bytes) + 8 * _MIB)))
    return best, limit


# ============================ MSA kernel ============================
def msa_kernel(msa_ref, w_ref, q_ref, out_ref):
    # msa_ref : (1, TN, L, d_init)
    # w_ref   : (d_init, d_msa)
    # q_ref   : (1, L, d_msa)   -- emb_q(seq) + bias (folded in the wrapper)
    # out_ref : (1, TN, L, d_msa)
    tn, L, d_init = msa_ref.shape[1], msa_ref.shape[2], msa_ref.shape[3]
    d_msa = w_ref.shape[1]
    x = msa_ref[0].reshape(tn * L, d_init)                 # collapse majors
    y = jnp.dot(x, w_ref[...], preferred_element_type=jnp.float32)
    out = y.reshape(tn, L, d_msa) + q_ref[...]             # broadcast over TN
    out_ref[0] = out.astype(out_ref.dtype)


def msa_embed(msa, q_fold, emb_w, *, out_dtype=jnp.float32, tn=None):
    B, N, L, d_init = msa.shape
    d_msa = emb_w.shape[1]
    assert d_msa % 128 == 0, "d_msa must be a multiple of 128 (lane-dense stores)"
    ob = jnp.dtype(out_dtype).itemsize
    auto_tn, vmem_limit = _pick_msa_tile(B, N, L, ob)
    if tn is None:
        tn = auto_tn
    assert N % tn == 0

    cost = pl.CostEstimate(
        flops=2 * B * N * L * d_init * d_msa + B * N * L * d_msa,
        transcendentals=0,
        bytes_accessed=(msa.size * msa.dtype.itemsize + q_fold.size * 4
                        + emb_w.size * 4 + B * N * L * d_msa * ob))

    return pl.pallas_call(
        msa_kernel,
        out_shape=jax.ShapeDtypeStruct((B, N, L, d_msa), out_dtype),
        grid=(B, N // tn),
        in_specs=[
            pl.BlockSpec((1, tn, L, d_init), lambda b, n: (b, n, 0, 0)),
            pl.BlockSpec((d_init, d_msa), lambda b, n: (0, 0)),
            pl.BlockSpec((1, L, d_msa), lambda b, n: (b, 0, 0)),
        ],
        out_specs=pl.BlockSpec((1, tn, L, d_msa), lambda b, n: (b, n, 0, 0)),
        compiler_params=pltpu.CompilerParams(
            dimension_semantics=("parallel", "parallel"),
            vmem_limit_bytes=vmem_limit),
        cost_estimate=cost,
    )(msa, emb_w, q_fold)


# ============================ Pair kernel ============================
def pair_kernel(idx_i_ref, idx_j_ref, sc_ref, left_ref, right_ref, tab_ref, out_ref):
    # idx_i_ref : (1, TI, 1) int32   -- idx[b, i] for this row tile
    # idx_j_ref : (1, 1, L)  int32   -- idx[b, j] (lane-dense)
    # sc_ref    : (1, TI, L) int32   -- same_chain[b, i, j] (lane-dense)
    # left_ref  : (1, L, dp)         -- emb_left(seq[b, j])
    # right_ref : (1, TI, dp)        -- emb_right(seq[b, i])
    # tab_ref   : (nb, dp)           -- fused (pos + chain + projection) table;
    #                                   relies on (seqsep == NBIN) <=> (same_chain == 0)
    # out_ref   : (1, TI, L, dp)
    ti = sc_ref.shape[1]
    L = sc_ref.shape[2]
    nb, dp = tab_ref.shape

    idx_i = idx_i_ref[0]                                    # (ti, 1)
    idx_j = idx_j_ref[0]                                    # (1, L)
    sc = sc_ref[0]                                          # (ti, L)

    seqsep = jnp.clip(idx_j - idx_i + MAXPOS, 0, NBIN - 1)  # (ti, L)
    seqsep = jnp.where(sc == 1, seqsep, NBIN)               # sentinel bin for inter-chain

    # one-hot against iota on the lane dim; collapse majors -> (ti*L, nb) for MXU
    oh = (lax.broadcasted_iota(jnp.int32, (ti, L, nb), 2)
          == seqsep[:, :, None]).astype(jnp.float32)
    pos = jnp.dot(oh.reshape(ti * L, nb), tab_ref[...],
                  preferred_element_type=jnp.float32)       # (ti*L, dp)

    out = (pos.reshape(ti, L, dp)
           + left_ref[0][None, :, :]       # broadcast over i
           + right_ref[0][:, None, :])     # broadcast over j
    out_ref[0] = out.astype(out_ref.dtype)


def pair_embed(idx_col, idx_row, sc, left, right, pos_total, *,
               out_dtype=jnp.float32, ti=None):
    B, L, dp = left.shape
    nb = pos_total.shape[0]
    assert dp % 128 == 0, "d_pair must be a multiple of 128 (lane-dense stores)"
    ob = jnp.dtype(out_dtype).itemsize
    auto_ti, vmem_limit = _pick_pair_tile(B, L, ob)
    if ti is None:
        ti = auto_ti
    assert L % ti == 0 and (ti % 8 == 0 or ti == L)

    cost = pl.CostEstimate(
        flops=2 * B * L * L * nb * dp + 3 * B * L * L * dp,
        transcendentals=0,
        bytes_accessed=(B * L * L * 4 + 2 * B * L * 4
                        + 2 * B * L * dp * 4 + nb * dp * 4
                        + B * L * L * dp * ob))

    return pl.pallas_call(
        pair_kernel,
        out_shape=jax.ShapeDtypeStruct((B, L, L, dp), out_dtype),
        grid=(B, L // ti),
        in_specs=[
            pl.BlockSpec((1, ti, 1), lambda b, i: (b, i, 0)),
            pl.BlockSpec((1, 1, L), lambda b, i: (b, 0, 0)),
            pl.BlockSpec((1, ti, L), lambda b, i: (b, i, 0)),
            pl.BlockSpec((1, L, dp), lambda b, i: (b, 0, 0)),
            pl.BlockSpec((1, ti, dp), lambda b, i: (b, i, 0)),
            pl.BlockSpec((nb, dp), lambda b, i: (0, 0)),
        ],
        out_specs=pl.BlockSpec((1, ti, L, dp), lambda b, i: (b, i, 0, 0)),
        compiler_params=pltpu.CompilerParams(
            dimension_semantics=("parallel", "parallel"),
            vmem_limit_bytes=vmem_limit),
        cost_estimate=cost,
    )(idx_col, idx_row, sc, left, right, pos_total)


# ============================ parameters + wrapper ============================
def init_params(key):
    ks = jax.random.split(key, 7)

    def lecun(k, shape, fan_in):
        return jax.random.normal(k, shape, jnp.float32) / jnp.sqrt(fan_in)

    return {
        "emb_w": lecun(ks[0], (D_INIT, D_MSA), D_INIT),       # Linear(d_init, d_msa)
        "emb_b": jnp.zeros((D_MSA,), jnp.float32),            # bias zero-init
        "emb_q": lecun(ks[1], (NAA, D_MSA), D_MSA),           # Embedding(23, d_msa)
        "emb_left": lecun(ks[2], (NAA, D_PAIR), D_PAIR),
        "emb_right": lecun(ks[3], (NAA, D_PAIR), D_PAIR),
        "pos_emb": lecun(ks[4], (NB, D_PAIR), D_PAIR),        # Embedding(nbin+1, d_pair)
        "pos_emb_chain": lecun(ks[5], (2, D_PAIR), D_PAIR),   # Embedding(2, d_pair)
        "pos_proj_w": lecun(ks[6], (2 * D_PAIR, D_PAIR), 2 * D_PAIR),  # Linear, no bias
    }


def msa_emb_forward(params, msa, seq, idx, same_chain, *,
                    out_dtype=jnp.float32, tn=None, ti=None):
    """Pallas forward. Returns (msa_out, pair_out).

    NOTE: the fused pos/chain table relies on the bijection
    (seqsep == NBIN) <=> (same_chain == 0), which holds because seqsep is
    clipped to NBIN-1 and same_chain is strictly {0, 1} (as in the PyTorch spec).
    """
    B, N, L, _ = msa.shape
    seq32 = seq.astype(jnp.int32)
    d_pair = params["emb_left"].shape[1]

    # ---- hoisted per-batch token embeddings (tiny (B, L, d) gathers) ----
    q_fold = params["emb_q"][seq32] + params["emb_b"]        # (B, L, d_msa), bias folded
    left = params["emb_left"][seq32]                         # (B, L, d_pair)
    right = params["emb_right"][seq32]                       # (B, L, d_pair)

    # ---- fold the (bias-free) projection into the embedding tables (exact) ----
    pos_fused = params["pos_emb"] @ params["pos_proj_w"][:d_pair]        # (NB, dp)
    ch_fused = params["pos_emb_chain"] @ params["pos_proj_w"][d_pair:]   # (2, dp)
    pos_total = pos_fused + ch_fused[1][None, :]
    pos_total = pos_total.at[NBIN].set(pos_fused[NBIN] + ch_fused[0])

    # ---- seqsep is computed inside the pair kernel (no B*L^2 HBM round-trip) ----
    idx32 = idx.astype(jnp.int32)
    idx_col = idx32[:, :, None]                              # (B, L, 1)
    idx_row = idx32[:, None, :]                              # (B, 1, L)
    sc32 = same_chain.astype(jnp.int32)                      # (B, L, L), lane-dense

    msa_out = msa_embed(msa, q_fold, params["emb_w"], out_dtype=out_dtype, tn=tn)
    pair_out = pair_embed(idx_col, idx_row, sc32, left, right, pos_total,
                          out_dtype=out_dtype, ti=ti)
    return msa_out, pair_out


def msa_emb_reference(params, msa, seq, idx, same_chain):
    """Pure-JAX reference mirroring the PyTorch forward (unfused params)."""
    msa_out = (jnp.einsum("bnli,io->bnlo", msa, params["emb_w"])
               + params["emb_b"]
               + params["emb_q"][seq][:, None, :, :])
    left = params["emb_left"][seq][:, None]                   # (B,1,L,dp)
    right = params["emb_right"][seq][:, :, None]              # (B,L,1,dp)
    pair = left + right
    sc = same_chain.astype(jnp.int32)
    seqsep = jnp.clip(idx[:, None, :] - idx[:, :, None] + MAXPOS, 0, NBIN - 1)
    seqsep = seqsep * sc + NBIN * (1 - sc)
    emb_residx = params["pos_emb"][seqsep]
    emb_chain = params["pos_emb_chain"][sc]
    pos = jnp.concatenate([emb_residx, emb_chain], -1) @ params["pos_proj_w"]
    return msa_out, pair + pos


if __name__ == "__main__":
    key = jax.random.PRNGKey(0)
    kp, k1, k2, k3 = jax.random.split(key, 4)

    B, N, L = 2, 4, 8
    params = init_params(kp)

    msa = jax.random.normal(k1, (B, N, L, D_INIT), jnp.float32)
    seq = jax.random.randint(k2, (B, L), 0, NAA, dtype=jnp.int32)
    # two chains with different residue spacings; second row exercises the clamp
    idx = jnp.stack([jnp.arange(L, dtype=jnp.int32),
                     jnp.arange(L, dtype=jnp.int32) * 12], axis=0)
    same_chain = jax.random.bernoulli(k3, 0.7, (B, L, L)).astype(jnp.int32)

    # f32 path (bit-comparable to the reference)
    msa_out, pair_out = msa_emb_forward(params, msa, seq, idx, same_chain)
    jax.block_until_ready((msa_out, pair_out))

    msa_ref, pair_ref = msa_emb_reference(params, msa, seq, idx, same_chain)
    assert msa_out.shape == (B, N, L, D_MSA) and pair_out.shape == (B, L, L, D_PAIR)
    assert bool(jnp.allclose(msa_out, msa_ref, rtol=1e-3, atol=1e-3)), "msa mismatch"
    assert bool(jnp.allclose(pair_out, pair_ref, rtol=1e-3, atol=1e-3)), "pair mismatch"

    # bf16-output path (halves the dominant HBM write traffic)
    msa_bf, pair_bf = msa_emb_forward(params, msa, seq, idx, same_chain,
                                      out_dtype=jnp.bfloat16)
    jax.block_until_ready((msa_bf, pair_bf))
    assert bool(jnp.allclose(msa_bf.astype(jnp.float32), msa_ref,
                             rtol=5e-2, atol=5e-2)), "bf16 msa mismatch"
    assert bool(jnp.allclose(pair_bf.astype(jnp.float32), pair_ref,
                             rtol=5e-2, atol=5e-2)), "bf16 pair mismatch"

    print("KERNEL_OK")
</pallas_src>

<mosaic_0001>
module attributes {stable_mosaic.version = 11 : i64} {
  func.func @msa_kernel(%arg0: i32, %arg1: i32, %arg2: memref<1x4x8x46xf32, #tpu.memory_space<vmem>>, %arg3: memref<46x256xf32, #tpu.memory_space<vmem>>, %arg4: memref<1x8x256xf32, #tpu.memory_space<vmem>>, %arg5: memref<1x4x8x256xf32, #tpu.memory_space<vmem>>) attributes {dimension_semantics = [#tpu.dimension_semantics<parallel>, #tpu.dimension_semantics<parallel>], iteration_bounds = array<i64: 2, 1>, scalar_prefetch = 0 : i64, scratch_operands = 0 : i64, tpu.core_type = #tpu.core_type<tc>, window_params = [{transform_indices = @transform_0, window_bounds = array<i64: 1, 4, 8, 46>}, {pipeline_mode = #tpu.pipeline_mode<synchronous>, transform_indices = @transform_1, window_bounds = array<i64: 46, 256>}, {transform_indices = @transform_2, window_bounds = array<i64: 1, 8, 256>}, {transform_indices = @transform_3, window_bounds = array<i64: 1, 4, 8, 256>}]} {
    %c0 = arith.constant 0 : index
    %c0_0 = arith.constant 0 : index
    %c0_1 = arith.constant 0 : index
    %c0_2 = arith.constant 0 : index
    %0 = vector.load %arg2[%c0, %c0_0, %c0_1, %c0_2] : memref<1x4x8x46xf32, #tpu.memory_space<vmem>>, vector<1x4x8x46xf32>
    %1 = vector.shape_cast %0 : vector<1x4x8x46xf32> to vector<4x8x46xf32>
    %2 = vector.shape_cast %1 : vector<4x8x46xf32> to vector<32x46xf32>
    %c0_3 = arith.constant 0 : index
    %c0_4 = arith.constant 0 : index
    %3 = vector.load %arg3[%c0_3, %c0_4] : memref<46x256xf32, #tpu.memory_space<vmem>>, vector<46x256xf32>
    %cst = arith.constant dense<0.000000e+00> : vector<32x256xf32>
    %4 = tpu.matmul %2, %3, %cst {dimension_numbers = #tpu.dot_dimension_numbers<[1], [0], [0], [1], [0, 0, 1, 1], [], []>} : vector<32x46xf32>, vector<46x256xf32>, vector<32x256xf32> -> vector<32x256xf32>
    %5 = vector.shape_cast %4 : vector<32x256xf32> to vector<4x8x256xf32>
    %c0_5 = arith.constant 0 : index
    %c0_6 = arith.constant 0 : index
    %c0_7 = arith.constant 0 : index
    %6 = vector.load %arg4[%c0_5, %c0_6, %c0_7] : memref<1x8x256xf32, #tpu.memory_space<vmem>>, vector<1x8x256xf32>
    %7 = vector.broadcast %6 : vector<1x8x256xf32> to vector<4x8x256xf32>
    %8 = arith.addf %5, %7 : vector<4x8x256xf32>
    %c0_8 = arith.constant 0 : index
    %c0_9 = arith.constant 0 : index
    %c0_10 = arith.constant 0 : index
    %c0_11 = arith.constant 0 : index
    %9 = vector.load %arg5[%c0_8, %c0_9, %c0_10, %c0_11] : memref<1x4x8x256xf32, #tpu.memory_space<vmem>>, vector<1x4x8x256xf32>
    %10 = vector.shape_cast %9 : vector<1x4x8x256xf32> to vector<4x8x256xf32>
    %11 = vector.shape_cast %8 : vector<4x8x256xf32> to vector<1x4x8x256xf32>
    tpu.vector_store %arg5[%c0_8, %c0_9, %c0_10, %c0_11], %11 {strides = array<i32>} : memref<1x4x8x256xf32, #tpu.memory_space<vmem>>, vector<1x4x8x256xf32>,
    return
  }
  func.func @transform_0(%arg0: i32, %arg1: i32) -> (i32, i32, i32, i32) {
    %c0_i32 = arith.constant 0 : i32
    %c0_i32_0 = arith.constant 0 : i32
    %c0_i32_1 = arith.constant 0 : i32
    return %arg0, %arg1, %c0_i32, %c0_i32_0 : i32, i32, i32, i32
  }
  func.func @transform_1(%arg0: i32, %arg1: i32) -> (i32, i32) {
    %c0_i32 = arith.constant 0 : i32
    %c0_i32_0 = arith.constant 0 : i32
    %c0_i32_1 = arith.constant 0 : i32
    return %c0_i32, %c0_i32_0 : i32, i32
  }
  func.func @transform_2(%arg0: i32, %arg1: i32) -> (i32, i32, i32) {
    %c0_i32 = arith.constant 0 : i32
    %c0_i32_0 = arith.constant 0 : i32
    %c0_i32_1 = arith.constant 0 : i32
    return %arg0, %c0_i32, %c0_i32_0 : i32, i32, i32
  }
  func.func @transform_3(%arg0: i32, %arg1: i32) -> (i32, i32, i32, i32) {
    %c0_i32 = arith.constant 0 : i32
    %c0_i32_0 = arith.constant 0 : i32
    %c0_i32_1 = arith.constant 0 : i32
    return %arg0, %arg1, %c0_i32, %c0_i32_0 : i32, i32, i32, i32
  }
}

</mosaic_0001>

<bundles_post_ra>
// kernel: tpu_custom_call.1
= control target key start
LH: loop header
LB: loop body
LE: loop exit
PB: predicated region body
PF: predicated region fallthrough
CT: control target
= control target key end

     0   :  { %8 = vsyncpa [#allocation3], 0  ;;  %s1081_s0 = inlined_call_operand.hbm [shape: f32[2,4,8,46], index: 0, kind: input, shape index: {}]   ;;  %s1082_s1 = inlined_call_operand.hbm [shape: f32[46,256], index: 1, kind: input, shape index: {}]   ;;  %s1083_s2 = inlined_call_operand.hbm [shape: f32[2,8,256], index: 2, kind: input, shape index: {}]   ;;  %s1084_s3 = inlined_call_operand.hbm [shape: f32[2,4,8,256], index: 3, kind: output, shape index: {}]  }
   0x1   :  { %10 = vsyncpa [#allocation3 + $0x1], 0 }
   0x2   :  { %11 = vsyncpa [#allocation6], 0 }
   0x3   :  { %12 = vsyncpa [#allocation4], 0 }
   0x4   :  { %14 = vsyncpa [#allocation4 + $0x1], 0  ;;  %s866_s12 = smov 0   ;;  %s868_s13 = smov 0  }
   0x5   :  { %s870_s14 = smov 0   ;;  %s872_s15 = smov 0  }
   0x6   :  { %s874_s16 = smov 0   ;;  %s876_s17 = smov 0  }
   0x7 LB: > { %s32_s18 = sadd.s32 1, %s829_s16  ;;  %s41_s19 = sadd.s32 1, %s821_s14  ;;  %s833_s17 = sphi %s876_s17, %s20_s17   ;;  %s829_s16 = sphi %s874_s16, %s1104_s16   ;;  %s825_s15 = sphi %s872_s15, %s1103_s15   ;;  %s821_s14 = sphi %s870_s14, %s1102_s14   ;;  %s817_s13 = sphi %s868_s13, %s1101_s13   ;;  %s813_s12 = sphi %s866_s12, %s1100_s12  }
   0x8   : > { %p34_p0 = scmp.ge.s32.totalorder %s32_s18, 2  ;;  %p48_p1 = scmp.ne.s32.totalorder %s821_s14, %s817_s13 }
   0x9   : > { %p49_p2 = scmp.eq.s32.totalorder %s833_s17, 0  ;;  %p604_p5 = scmp.lt.s32.totalorder %s833_s17, 2 }
   0xa   : > { %s1106_s18 = smov (%p34_p0, %s32_s18), 0  ;;  %s166_s21 = sand.u32 1, %s833_s17  }
   0xb   : > { %p50_p4 = por %p49_p2, %p48_p1  ;;  %s36_s20 = ssub.s32 %s829_s16, %s1106_s18 }
   0xc   : > { %p39_p6 = scmp.eq.s32.totalorder %s36_s20, 0  ;;  %s168_s22 = sand.u32 1, %s821_s14  }
   0xd   : > { %s563_s23 = sshll.u32 %s829_s16, 9  ;;  %s541_s25 = sshll.u32 %s168_s22, 5 }
   0xe   : > { %s914_s24 = scalar_select %p39_p6, %s821_s14, %s41_s19  }
   0xf   : > { %s178_s28 = scalar_lea.hbm %s1081_s0, %s563_s23  ;;  %p921_p7 = pnand %p604_p5, %p50_p4 }
  0x10   : > { %s170_s30 = scalar_lea.vmem [#allocation2], %s541_s25  ;;  %s925_s5 = scalar_lea.sflag [#allocation3], %s166_s21 }
  0x11   : > { %s179_s4 = sshll.u32 %s170_s30, 4  ;;  %p1086_p8 = pneg %p921_p7  ;;  %s180_s4 = int_to_ptr.vmem [resolvable:$true] %s179_s4 }
  0x12   : > { %s676_s6 = scalar_lea.vmem %s180_s4, 512  ;;  %s835_s7 = smov [#allocation2]  }
  0x13   : > { %p677_p9 = scmp.ne.s32.totalorder %s180_s4, %s676_s6  ;;  %s681_s8 = sshll.u32 %s835_s7, 4  ;;  %s682_s8 = int_to_ptr.vmem [resolvable:$false] %s681_s8 }
  0x14   : > { %s683_s9 = scalar_lea.vmem %s682_s8, 1024  ;;  %p684_p12 = scmp.lt.s32.totalorder %s180_s4, %s682_s8 }
  0x15   : > { %p679_p10 = pnand %p677_p9, %p1086_p8  ;;  %p685_p13 = scmp.lt.s32.totalorder %s683_s9, %s676_s6 }
  0x17   : > { %p680_p11 = pneg %p679_p10  ;;  %p686_p0 = por %p685_p13, %p684_p12 }
  0x19   : > { %p687_p2 = pnand %p686_p0, %p680_p11 }
  0x1b   : > { %690 = shalt.err (!%p687_p2)
}
  0x1c   : > { %s836_s10 = smov 128   ;;  %s837_s11 = smov 8  }
  0x1d   : > { %595 = dma.hbm_to_vmem [thread:$0]  (!%p921_p7), %s178_s28, 512, %s180_s4, %s925_s5, %s836_s10, %s836_s10, %s837_s11  }
  0x1e   : > { %s936_s19 = sadd.s32 4294967295, %s833_s17   ;;  %s537_s20 = sadd.s32 4294967294, %s833_s17  }
  0x1f   : > { %p54_p4 = scmp.ne.s32.totalorder %s817_s13, %s813_s12  ;;  %p1085_p5 = scmp.eq.s32.totalorder %s936_s19, 0 }
  0x20   : > { %p127_p6 = scmp.eq.s32.totalorder %s936_s19, 1  ;;  %p133_p9 = scmp.eq.s32.totalorder %s537_s20, 1 }
  0x21   : > { %p538_p10 = scmp.ge.s32.totalorder %s833_s17, 1  ;;  %p946_p11 = por %p1085_p5, %p54_p4 }
  0x22   : > { %p953_p12 = por %p127_p6, %p48_p1  ;;  %p957_p13 = por %p133_p9, %p54_p4 }
  0x23   : > { %p140_p0 = scmp.lt.s32.totalorder %s833_s17, 3  ;;  %s838_s27 = smov [#allocation5]  }
  0x24   : > { %s1090_s23 = scalar_select %p953_p12, 1, 0 }
  0x25   : > { %s1091_s25 = scalar_select %p957_p13, 1, 0 }
  0x26   : > { %p962_p2 = pnand %p538_p10, %p140_p0  ;;  %s152_s28 = sshll.u32 %s838_s27, 4  ;;  %s153_s28 = int_to_ptr.vmem [resolvable:$true] %s152_s28 }
  0x27   : > { %s544_s30 = sshll.u32 %s168_s22, 4  ;;  %s564_s4 = sshll.u32 %s829_s16, 8 }
  0x28   : > { %p588_p3 = pneg %p962_p2  ;;  %s980_s9 = scalar_lea.hbm %s1083_s2, %s564_s4 }
  0x29   : > { %s193_s10 = scalar_lea.vmem [#allocation7], %s544_s30  ;;  %s702_s20 = scalar_lea.vmem %s153_s28, 1536 }
  0x2a   : > { %p973_p1 = pnand %p588_p3, %p1085_p5  ;;  %s201_s11 = sshll.u32 %s193_s10, 4  ;;  %s202_s11 = int_to_ptr.vmem [resolvable:$true] %s201_s11 }
  0x2b   : > { %p703_p6 = scmp.ne.s32.totalorder %s153_s28, %s702_s20  ;;  %p710_p0 = scmp.lt.s32.totalorder %s153_s28, %s153_s28 }
  0x2c   : > { %p693_p4 = pneg %p973_p1  ;;  %p711_p3 = scmp.lt.s32.totalorder %s702_s20, %s702_s20 }
  0x2e   : > { %p705_p9 = pnand %p703_p6, %p693_p4  ;;  %p712_p5 = por %p711_p3, %p710_p0 }
  0x30   : > { %p706_p10 = pneg %p705_p9 }
  0x32   : > { %p713_p8 = pnand %p712_p5, %p706_p10 }
  0x34   : > { %716 = shalt.err (!%p713_p8)
}
  0x35   : > { %s839_s22 = smov 256   ;;  %s840_s27 = smov 16  }
  0x36   : > { %591 = dma.hbm_to_vmem [thread:$0]  (!%p973_p1), %s1082_s1, 1536, %s153_s28, [#allocation6], %s839_s22, %s839_s22, %s840_s27  }
  0x37   : > { %s730_s7 = scalar_lea.vmem %s202_s11, 256  ;;  %p1094_p12 = pneg %p921_p7 }
  0x38   : > { %p731_p13 = scmp.ne.s32.totalorder %s202_s11, %s730_s7  ;;  %s841_s8 = smov [#allocation7]  }
  0x39   : > { %s735_s10 = sshll.u32 %s841_s8, 4  ;;  %s736_s10 = int_to_ptr.vmem [resolvable:$false] %s735_s10 }
  0x3a   : > { %p733_p4 = pnand %p731_p13, %p1094_p12  ;;  %s737_s20 = scalar_lea.vmem %s736_s10, 512 }
  0x3b   : > { %p738_p8 = scmp.lt.s32.totalorder %s202_s11, %s736_s10  ;;  %p739_p5 = scmp.lt.s32.totalorder %s737_s20, %s730_s7 }
  0x3c   : > { %p734_p6 = pneg %p733_p4 }
  0x3d   : > { %p740_p9 = por %p739_p5, %p738_p8 }
  0x3f   : > { %p741_p10 = pnand %p740_p9, %p734_p6 }
  0x41   : > { %744 = shalt.err (!%p741_p10)
}
  0x42   : > { %598 = dma.hbm_to_vmem [thread:$0]  (!%p921_p7), %s980_s9, 256, %s202_s11, %s925_s5  }
  0x43   : > { %210 = sbr.rel (%p962_p2) target bundleno = 308 (0x134), region = 32  ;;  %s212_s28 = sand.u32 (!%p962_p2), 1, %s936_s19  }
  0x44   : > { %s1000_s6 = sand.u32 (!%p962_p2), 1, %s817_s13   ;;  %s213_s27 = scalar_lea.sflag (!%p962_p2), [#allocation3], %s212_s28 }
  0x45   : > { %s548_s22 = sshll.u32 (!%p962_p2), %s1000_s6, 5 }
  0x46   : > { %s1003_s4 = scalar_lea.vmem (!%p962_p2), [#allocation2], %s548_s22 }
  0x48   : > { %796 = dma.done.wait (%p946_p11), %s213_s27, 512  }
  0x49   : > { %798 = vsyncadd (%p946_p11), %s213_s27, 4294966784  ;;  %p1095_p7 = scmp.eq.s32.totalorder %s936_s19, 0 }
  0x4b   : > { %800 = dma.done.wait (%p1095_p7), [#allocation6], 1536   ;;  %p1096_p12 = pmov %p1095_p7 }
  0x4c   : > { %s550_s29 = sshll.u32 %s1000_s6, 4 }
  0x4d   : > { %802 = vsyncadd (%p1096_p12), [#allocation6], 4294965760  ;;  %s1014_s5 = scalar_lea.vmem [#allocation7], %s550_s29 }
  0x4e   : > { %804 = dma.done.wait (%p946_p11), %s213_s27, 256  }
  0x4f   : > { %806 = vsyncadd (%p946_p11), %s213_s27, 4294967040  ;;  %v842_v0 = vmov 0.0   ;;  %vm288_vm0 = vcmask 1045504   ;;  %v274_v1 = vld [vmem:[#allocation5 + $0x58] sm:$0x3f]  ;;  %v272_v3 = vld [vmem:[#allocation5 + $0x48] sm:$0xff] }
  0x50   : > { %359 = vmatprep.mubr.f32.mxu0 %v842_v0  ;;  %371 = vmatprep.mubr.f32.mxu1 %v842_v0  ;;  %v273_v2 = vld [vmem:[#allocation5 + $0x50] sm:$0x3f]  ;;  %v271_v4 = vld [vmem:[#allocation5 + $0x40] sm:$0xff]  ;;  %v270_v5 = vld [vmem:[#allocation5 + $0x38] sm:$0xff]  ;;  %vm275_vm1 = vcmask 375808   ;;  %s551_s19 = sshll.u32 %s1000_s6, 6 }
  0x51   : > { %552 = vmatprep.subr.msk.mxu0 %vm288_vm0, %v274_v1  ;;  %566 = vmatprep.subr.msk.mxu1 %vm288_vm0, %v274_v1  ;;  %v269_v6 = vld [vmem:[#allocation5 + $0x30] sm:$0xff]  ;;  %v268_v7 = vld [vmem:[#allocation5 + $0x28] sm:$0xff]  ;;  %v267_v8 = vld [vmem:[#allocation5 + $0x20] sm:$0xff]  ;;  %s256_s21 = scalar_lea.vmem [#allocation8], %s551_s19  ;;  %s565_s9 = sshll.u32 %s825_s15, 10 }
  0x52   : > { %553 = vmatpush1.msk.msra.mxu0 %vm288_vm0, %v273_v2  ;;  %572 = vmatpush1.msk.msra.mxu1 %vm288_vm0, %v273_v2  ;;  %v266_v9 = vld [vmem:[#allocation5 + $0x18] sm:$0xff]  ;;  %v265_v10 = vld [vmem:[#allocation5 + $0x10] sm:$0xff]  ;;  %v264_v11 = vld [vmem:[#allocation5 + $0x8] sm:$0xff]  ;;  %s419_s26 = sshll.u32 %s256_s21, 4  ;;  %s1033_s7 = scalar_lea.hbm %s1084_s3, %s565_s9  ;;  %s1028_s26 = int_to_ptr.vmem [resolvable:$true] %s419_s26 }
  0x53   : > { %317 = vmatprep.subr.mxu0 %v272_v3  ;;  %567 = vmatprep.subr.mxu1 %v272_v3  ;;  %v263_v12 = vld [vmem:[#allocation5] sm:$0xff]  ;;  %v261_v14 = vld [vmem:[%s1003_s4 + $0x10] sm:$0xff]  ;;  %v260_v15 = vld [vmem:[%s1003_s4 + $0x8] sm:$0xff]  ;;  %s403_s15 = scalar_lea.sflag [#allocation4], %s1000_s6  ;;  %s745_s8 = scalar_lea.vmem %s1028_s26, 1024 }
  0x54   : > { %318 = vmatpush1.msra.mxu0 %v271_v4  ;;  %573 = vmatpush1.msra.mxu1 %v271_v4  ;;  %v259_v13 = vld [vmem:[%s1003_s4] sm:$0xff]  ;;  %v262_v16 = vld [vmem:[%s1003_s4 + $0x18] sm:$0xff]  ;;  %p746_p11 = scmp.ne.s32.totalorder %s1028_s26, %s745_s8  ;;  %p1097_p13 = scmp.ne.s32.totalorder %s1090_s23, 0 }
  0x55   : > { %319 = vmatprep.subr.mxu0 %v270_v5  ;;  %568 = vmatprep.subr.mxu1 %v270_v5  ;;  %v384_v17 = vld [vmem:[%s1014_s5] sm:$0xff]  ;;  %v385_v20 = vld [vmem:[%s1014_s5 + $0x8] sm:$0xff]  ;;  %s843_s10 = smov [#allocation8]  }
  0x56   : > { %320 = vmatpush1.msra.mxu0 %v269_v6  ;;  %574 = vmatpush1.msra.mxu1 %v269_v6  ;;  %p747_p2 = pnand %p746_p11, %p1097_p13  ;;  %s749_s20 = sshll.u32 %s843_s10, 4  ;;  %s750_s20 = int_to_ptr.vmem [resolvable:$false] %s749_s20 }
  0x57   : > { %321 = vmatprep.subr.mxu0 %v268_v7  ;;  %569 = vmatprep.subr.mxu1 %v268_v7  ;;  %s751_s28 = scalar_lea.vmem %s750_s20, 2048  ;;  %p752_p0 = scmp.lt.s32.totalorder %s1028_s26, %s750_s20 }
  0x58   : > { %322 = vmatpush1.msra.mxu0 %v267_v8  ;;  %575 = vmatpush1.msra.mxu1 %v267_v8  ;;  %p748_p1 = pneg %p747_p2  ;;  %p753_p3 = scmp.lt.s32.totalorder %s751_s28, %s745_s8 }
  0x59   : > { %323 = vmatprep.subr.mxu0 %v266_v9  ;;  %570 = vmatprep.subr.mxu1 %v266_v9 }
  0x5a   : > { %324 = vmatpush1.msra.mxu0 %v265_v10  ;;  %576 = vmatpush1.msra.mxu1 %v265_v10  ;;  %p754_p4 = por %p753_p3, %p752_p0 }
  0x5b   : > { %325 = vmatprep.subr.mxu0 %v264_v11  ;;  %571 = vmatprep.subr.mxu1 %v264_v11 }
  0x5c   : > { %326 = vmatpush1.msra.mxu0 %v263_v12  ;;  %577 = vmatpush1.msra.mxu1 %v263_v12  ;;  %p755_p6 = pnand %p754_p4, %p748_p1 }
  0x5d   : > { %554 = vmatmul.mubr.msk.f32.vlgmr.msra.gmra.mxu0 %vm275_vm1, %v259_v13  ;;  %556 = vmatmul.mubr.msk.f32.vlgmr.msra.gmra.mxu1 %vm275_vm1, %v261_v14 }
  0x5e   : > { %365 = vmatprep.mubr.f32.mxu0 %v842_v0  ;;  %377 = vmatprep.mubr.f32.mxu1 %v842_v0 }
  0x61   : > { %555 = vmatmul.mubr.msk.f32.gmra.mxu0 %vm275_vm1, %v260_v15  ;;  %557 = vmatmul.mubr.msk.f32.gmra.mxu1 %vm275_vm1, %v262_v16 }
 0x11d   : > { %v361_v18 = vpop.f32.mrf.mxu0  ;;  %v373_v19 = vpop.f32.mrf.mxu1 }
 0x11e   : > { %v386_v21 = vadd.f32 %v384_v17, %v361_v18  ;;  %v390_v22 = vadd.f32 %v384_v17, %v373_v19 }
 0x11f   : > { %v363_v23 = vpop.f32.mrf.mxu0  ;;  %v375_v24 = vpop.f32.mrf.mxu1 }
 0x120   : > { %394 = vst [vmem:[%s256_s21] sm:$0xff] %v386_v21  ;;  %398 = vst [vmem:[%s256_s21 + $0x20] sm:$0xff] %v390_v22  ;;  %v387_v25 = vadd.f32 %v385_v20, %v363_v23  ;;  %v391_v26 = vadd.f32 %v385_v20, %v375_v24 }
 0x121   : > { %v367_v27 = vpop.f32.mrf.mxu0  ;;  %v379_v28 = vpop.f32.mrf.mxu1 }
 0x122   : > { %395 = vst [vmem:[%s256_s21 + $0x8] sm:$0xff] %v387_v25  ;;  %399 = vst [vmem:[%s256_s21 + $0x28] sm:$0xff] %v391_v26  ;;  %v388_v29 = vadd.f32 %v384_v17, %v367_v27  ;;  %v392_v30 = vadd.f32 %v384_v17, %v379_v28 }
 0x123   : > { %v369_v31 = vpop.f32.mrf.mxu0  ;;  %v381_v32 = vpop.f32.mrf.mxu1 }
 0x124   : > { %396 = vst [vmem:[%s256_s21 + $0x10] sm:$0xff] %v388_v29  ;;  %400 = vst [vmem:[%s256_s21 + $0x30] sm:$0xff] %v392_v30  ;;  %v389_v33 = vadd.f32 %v385_v20, %v369_v31  ;;  %v393_v34 = vadd.f32 %v385_v20, %v381_v32 }
 0x126   : > { %397 = vst [vmem:[%s256_s21 + $0x18] sm:$0xff] %v389_v33  ;;  %401 = vst [vmem:[%s256_s21 + $0x38] sm:$0xff] %v393_v34 }
 0x127   : > { %758 = shalt.err (!%p755_p6)
}
 0x128   : > { %s759_s22 = scalar_lea.hbm %s1033_s7, 1024  ;;  %s763_s29 = scalar_lea.hbm %s1084_s3, 2048 }
 0x129   : > { %p760_p8 = scmp.ne.s32.totalorder %s1033_s7, %s759_s22  ;;  %p764_p10 = scmp.lt.s32.totalorder %s1033_s7, %s1084_s3 }
 0x12a   : > { %p765_p7 = scmp.lt.s32.totalorder %s763_s29, %s759_s22 }
 0x12b   : > { %p761_p5 = pnand %p760_p8, %p1097_p13 }
 0x12c   : > { %p766_p12 = por %p765_p7, %p764_p10 }
 0x12d   : > { %p762_p9 = pneg %p761_p5 }
 0x12f   : > { %p767_p11 = pnand %p766_p12, %p762_p9 }
 0x131   : > { %770 = shalt.err (!%p767_p11)
}
 0x132   : > { %s844_s21 = smov 256   ;;  %s845_s9 = smov 16  }
 0x133   : > { %586 = dma.vmem_to_hbm [thread:$0]  (%p1097_p13), %s1028_s26, 1024, %s1033_s7, %s403_s15, %s844_s21, %s844_s21, %s845_s9  }
 0x134 PF: > { %s434_s11 = sand.u32 1, %s813_s12   ;;  %p1098_p2 = scmp.ne.s32.totalorder %s1091_s25, 0 }
 0x135   : > { %p1099_p1 = scmp.ge.s32.totalorder %s833_s17, 2  ;;  %s435_s30 = scalar_lea.sflag [#allocation4], %s434_s11 }
 0x137   : > { %p600_p0 = pnand %p1099_p1, %p1098_p2 }
 0x139   : > { %p601_p3 = pneg %p600_p0 }
 0x13b   : > { %808 = dma.done.wait (%p601_p3), %s435_s30, 1024  }
 0x13c   : > { %810 = vsyncadd (%p601_p3), %s435_s30, 4294966272  ;;  %s20_s17 = sadd.s32 1, %s833_s17   ;;  %s1100_s12 = smov %s817_s13 }
 0x13d   : > { %p17_p4 = scmp.ge.s32.totalorder %s20_s17, 4   ;;  %s1101_s13 = smov %s821_s14 }
 0x13e   : > { %s1102_s14 = smov %s914_s24  ;;  %s1103_s15 = smov %s829_s16 }
 0x13f   : > { %s1104_s16 = smov %s1106_s18  ;;  %19 = sbr.rel (!%p17_p4) target bundleno = 7 (0x7), region = 92 }
 0x144   :  { %440 = vsyncpa [#allocation3], 1 }
 0x145   :  { %442 = vsyncpa [#allocation3 + $0x1], 1 }
 0x146   :  { %443 = vsyncpa [#allocation6], 1 }
 0x147   :  { %444 = vsyncpa [#allocation4], 1 }
 0x148   :  { %446 = vsyncpa [#allocation4 + $0x1], 1 }

</bundles_post_ra>
